<compile_context>
chip_gen: v7x
topology: tpu7x:2x2x1
jax: 0.10.0
libtpu: 0.0.40
codegen_flags: <defaults>
</compile_context>

<pallas_src>
import jax
import jax.numpy as jnp
from jax import lax
from jax.experimental import pallas as pl
from jax.experimental.pallas import tpu as pltpu


def lstm_model_kernel(x_ref, w_ih_ref, w_hh_ref, b_g_ref,
                      w_attn_ref, b_attn_ref,
                      w1_ref, b1_ref, w2_ref, b2_ref, w3_ref, b3_ref,
                      probs_ref, attn_ref):
    T, B, I = x_ref.shape
    H = w_hh_ref.shape[0]

    # ---- hoisted input projection: one batched matmul for all timesteps ----
    x_flat = x_ref[...].reshape(T * B, I)                              # (T*B, I)
    xg = (jnp.dot(x_flat, w_ih_ref[...], preferred_element_type=jnp.float32)
          + b_g_ref[...])                                              # (T*B, 4H)

    # lane mask selecting the tanh ("g") gate block [2H, 3H) — hoisted out of loop
    lane = lax.broadcasted_iota(jnp.int32, (B, 4 * H), 1)
    g_mask = (lane >= 2 * H) & (lane < 3 * H)

    w_attn = w_attn_ref[...]                                           # (1, H)

    h = jnp.zeros((B, H), jnp.float32)
    c = jnp.zeros((B, H), jnp.float32)
    score_cols = []

    # T is static and small: Python unroll (fully visible to the scheduler).
    for t in range(T):
        gates = (xg[t * B:(t + 1) * B, :]
                 + jnp.dot(h, w_hh_ref[...],
                           preferred_element_type=jnp.float32))        # (B, 4H)
        # full-width activations, lane-select the tanh block
        act = jnp.where(g_mask, jnp.tanh(gates), jax.nn.sigmoid(gates))
        i_g = act[:, 0 * H:1 * H]
        f_g = act[:, 1 * H:2 * H]
        g_g = act[:, 2 * H:3 * H]
        o_g = act[:, 3 * H:4 * H]
        c = f_g * c + i_g * g_g
        h = o_g * jnp.tanh(c)
        # attention score for this step (cross-lane reduce -> XLU slot, has slack)
        score_cols.append(jnp.sum(h * w_attn, axis=1, keepdims=True))  # (B, 1)

    # ---- attention softmax over time (lane axis of a (B, T) tile) ----
    scores = jnp.concatenate(score_cols, axis=1) + b_attn_ref[...]     # (B, T)
    m = jnp.max(scores, axis=1, keepdims=True)
    e = jnp.exp(scores - m)
    w = e * pl.reciprocal(jnp.sum(e, axis=1, keepdims=True), approx=True)
    attn_ref[...] = w                                                  # (B, T)

    # out[:, -1, :] of (lstm_out * weights) == h_T * w[:, -1]
    feat = h * w[:, T - 1:T]                                           # (B, H)

    # ---- fc head (dropout = identity in eval mode) ----
    z1 = jnp.maximum(
        jnp.dot(feat, w1_ref[...], preferred_element_type=jnp.float32) + b1_ref[...], 0.0)
    z2 = jnp.maximum(
        jnp.dot(z1, w2_ref[...], preferred_element_type=jnp.float32) + b2_ref[...], 0.0)
    logits = jnp.dot(z2, w3_ref[...], preferred_element_type=jnp.float32) + b3_ref[...]

    # final softmax over classes (torch dim=1 on (B, O))
    lm = jnp.max(logits, axis=1, keepdims=True)
    le = jnp.exp(logits - lm)
    probs_ref[...] = le * pl.reciprocal(jnp.sum(le, axis=1, keepdims=True), approx=True)


def lstm_model_forward(x, params):
    """x: (B, T, I) float32, batch_first like the PyTorch module."""
    B, T, I = x.shape
    O = params["w3"].shape[1]
    x_tm = jnp.transpose(x, (1, 0, 2)).astype(jnp.float32)             # (T, B, I)

    def full_spec(shape):
        return pl.BlockSpec(shape, lambda i, s=shape: (0,) * len(s))

    in_arrays = [
        x_tm,
        params["w_ih"], params["w_hh"], params["b_g"],
        params["w_attn"], params["b_attn"],
        params["w1"], params["b1"],
        params["w2"], params["b2"],
        params["w3"], params["b3"],
    ]
    in_specs = [full_spec(a.shape) for a in in_arrays]

    probs, attn = pl.pallas_call(
        lstm_model_kernel,
        grid=(1,),
        in_specs=in_specs,
        out_specs=(full_spec((B, O)), full_spec((B, T))),
        out_shape=(jax.ShapeDtypeStruct((B, O), jnp.float32),
                   jax.ShapeDtypeStruct((B, T), jnp.float32)),
        compiler_params=pltpu.CompilerParams(
            dimension_semantics=("arbitrary",),
            vmem_limit_bytes=16 * 1024 * 1024),
    )(*in_arrays)
    return probs, attn.reshape(B, T, 1)


def make_params(key, input_size, hidden_size, output_size):
    ks = jax.random.split(key, 12)
    sc = 0.1
    H = hidden_size
    return {
        "w_ih":   sc * jax.random.normal(ks[0], (input_size, 4 * H), jnp.float32),
        "w_hh":   sc * jax.random.normal(ks[1], (H, 4 * H), jnp.float32),
        "b_g":    sc * jax.random.normal(ks[2], (1, 4 * H), jnp.float32),  # b_ih + b_hh fused
        "w_attn": sc * jax.random.normal(ks[3], (1, H), jnp.float32),
        "b_attn": sc * jax.random.normal(ks[4], (1, 1), jnp.float32),
        "w1":     sc * jax.random.normal(ks[5], (H, 64), jnp.float32),
        "b1":     sc * jax.random.normal(ks[6], (1, 64), jnp.float32),
        "w2":     sc * jax.random.normal(ks[7], (64, 32), jnp.float32),
        "b2":     sc * jax.random.normal(ks[8], (1, 32), jnp.float32),
        "w3":     sc * jax.random.normal(ks[9], (32, output_size), jnp.float32),
        "b3":     sc * jax.random.normal(ks[10], (1, output_size), jnp.float32),
    }


def reference_forward(x, p):
    """Pure-JAX reference reproducing the same math (for a correctness check)."""
    B, T, I = x.shape
    H = p["w_hh"].shape[0]
    h = jnp.zeros((B, H), jnp.float32)
    c = jnp.zeros((B, H), jnp.float32)
    hs = []
    for t in range(T):
        gates = x[:, t, :] @ p["w_ih"] + h @ p["w_hh"] + p["b_g"][0]
        i_g = jax.nn.sigmoid(gates[:, :H])
        f_g = jax.nn.sigmoid(gates[:, H:2 * H])
        g_g = jnp.tanh(gates[:, 2 * H:3 * H])
        o_g = jax.nn.sigmoid(gates[:, 3 * H:])
        c = f_g * c + i_g * g_g
        h = o_g * jnp.tanh(c)
        hs.append(h)
    hs = jnp.stack(hs, axis=1)                                          # (B, T, H)
    scores = jnp.einsum("bth,h->bt", hs, p["w_attn"][0]) + p["b_attn"][0, 0]
    w = jax.nn.softmax(scores, axis=1)                                  # (B, T)
    feat = hs[:, -1, :] * w[:, -1:]
    z1 = jnp.maximum(feat @ p["w1"] + p["b1"], 0.0)
    z2 = jnp.maximum(z1 @ p["w2"] + p["b2"], 0.0)
    logits = z2 @ p["w3"] + p["b3"]
    return jax.nn.softmax(logits, axis=1), w.reshape(B, T, 1)


if __name__ == "__main__":
    B, T, I, H, O = 8, 8, 16, 32, 4
    key = jax.random.PRNGKey(0)
    kx, kp = jax.random.split(key)
    x = jax.random.normal(kx, (B, T, I), jnp.float32)
    params = make_params(kp, I, H, O)

    probs, attn_w = lstm_model_forward(x, params)
    probs = jax.block_until_ready(probs)
    attn_w = jax.block_until_ready(attn_w)

    ref_probs, ref_attn = reference_forward(x, params)
    assert probs.shape == (B, O) and attn_w.shape == (B, T, 1)
    # tolerance loosened slightly because the softmax denominators use the
    # EUP approximate reciprocal (rel. err ~1e-4)
    assert jnp.allclose(probs, ref_probs, atol=2e-3, rtol=2e-3)
    assert jnp.allclose(attn_w, ref_attn, atol=2e-3, rtol=2e-3)

    print("KERNEL_OK")
</pallas_src>

<mosaic_0001>
module attributes {stable_mosaic.version = 11 : i64} {
  func.func @lstm_model_kernel(%arg0: i32, %arg1: memref<8x8x16xf32, #tpu.memory_space<vmem>>, %arg2: memref<16x128xf32, #tpu.memory_space<vmem>>, %arg3: memref<32x128xf32, #tpu.memory_space<vmem>>, %arg4: memref<1x128xf32, #tpu.memory_space<vmem>>, %arg5: memref<1x32xf32, #tpu.memory_space<vmem>>, %arg6: memref<1x1xf32, #tpu.memory_space<vmem>>, %arg7: memref<32x64xf32, #tpu.memory_space<vmem>>, %arg8: memref<1x64xf32, #tpu.memory_space<vmem>>, %arg9: memref<64x32xf32, #tpu.memory_space<vmem>>, %arg10: memref<1x32xf32, #tpu.memory_space<vmem>>, %arg11: memref<32x4xf32, #tpu.memory_space<vmem>>, %arg12: memref<1x4xf32, #tpu.memory_space<vmem>>, %arg13: memref<8x4xf32, #tpu.memory_space<vmem>>, %arg14: memref<8x8xf32, #tpu.memory_space<vmem>>) attributes {dimension_semantics = [#tpu.dimension_semantics<arbitrary>], iteration_bounds = array<i64: 1>, scalar_prefetch = 0 : i64, scratch_operands = 0 : i64, tpu.core_type = #tpu.core_type<tc>, window_params = [{pipeline_mode = #tpu.pipeline_mode<synchronous>, transform_indices = @transform_0, window_bounds = array<i64: 8, 8, 16>}, {pipeline_mode = #tpu.pipeline_mode<synchronous>, transform_indices = @transform_1, window_bounds = array<i64: 16, 128>}, {pipeline_mode = #tpu.pipeline_mode<synchronous>, transform_indices = @transform_2, window_bounds = array<i64: 32, 128>}, {pipeline_mode = #tpu.pipeline_mode<synchronous>, transform_indices = @transform_3, window_bounds = array<i64: 1, 128>}, {pipeline_mode = #tpu.pipeline_mode<synchronous>, transform_indices = @transform_4, window_bounds = array<i64: 1, 32>}, {pipeline_mode = #tpu.pipeline_mode<synchronous>, transform_indices = @transform_5, window_bounds = array<i64: 1, 1>}, {pipeline_mode = #tpu.pipeline_mode<synchronous>, transform_indices = @transform_6, window_bounds = array<i64: 32, 64>}, {pipeline_mode = #tpu.pipeline_mode<synchronous>, transform_indices = @transform_7, window_bounds = array<i64: 1, 64>}, {pipeline_mode = #tpu.pipeline_mode<synchronous>, transform_indices = @transform_8, window_bounds = array<i64: 64, 32>}, {pipeline_mode = #tpu.pipeline_mode<synchronous>, transform_indices = @transform_9, window_bounds = array<i64: 1, 32>}, {pipeline_mode = #tpu.pipeline_mode<synchronous>, transform_indices = @transform_10, window_bounds = array<i64: 32, 4>}, {pipeline_mode = #tpu.pipeline_mode<synchronous>, transform_indices = @transform_11, window_bounds = array<i64: 1, 4>}, {pipeline_mode = #tpu.pipeline_mode<synchronous>, transform_indices = @transform_12, window_bounds = array<i64: 8, 4>}, {pipeline_mode = #tpu.pipeline_mode<synchronous>, transform_indices = @transform_13, window_bounds = array<i64: 8, 8>}]} {
    %c0 = arith.constant 0 : index
    %c0_0 = arith.constant 0 : index
    %c0_1 = arith.constant 0 : index
    %0 = vector.load %arg1[%c0, %c0_0, %c0_1] : memref<8x8x16xf32, #tpu.memory_space<vmem>>, vector<8x8x16xf32>
    %1 = vector.shape_cast %0 : vector<8x8x16xf32> to vector<64x16xf32>
    %c0_2 = arith.constant 0 : index
    %c0_3 = arith.constant 0 : index
    %2 = vector.load %arg2[%c0_2, %c0_3] : memref<16x128xf32, #tpu.memory_space<vmem>>, vector<16x128xf32>
    %cst = arith.constant dense<0.000000e+00> : vector<64x128xf32>
    %3 = tpu.matmul %1, %2, %cst {dimension_numbers = #tpu.dot_dimension_numbers<[1], [0], [0], [1], [0, 0, 1, 1], [], []>} : vector<64x16xf32>, vector<16x128xf32>, vector<64x128xf32> -> vector<64x128xf32>
    %c0_4 = arith.constant 0 : index
    %c0_5 = arith.constant 0 : index
    %4 = vector.load %arg4[%c0_4, %c0_5] : memref<1x128xf32, #tpu.memory_space<vmem>>, vector<1x128xf32>
    %5 = vector.broadcast %4 : vector<1x128xf32> to vector<64x128xf32>
    %6 = arith.addf %3, %5 : vector<64x128xf32>
    %7 = tpu.iota {dimensions = array<i32: 1>} : vector<8x128xi32>
    %c64_i32 = arith.constant 64 : i32
    %8 = vector.broadcast %c64_i32 : i32 to vector<8x128xi32>
    %9 = arith.cmpi sge, %7, %8 : vector<8x128xi32>
    %c96_i32 = arith.constant 96 : i32
    %10 = vector.broadcast %c96_i32 : i32 to vector<8x128xi32>
    %11 = arith.cmpi slt, %7, %10 : vector<8x128xi32>
    %12 = arith.andi %9, %11 : vector<8x128xi1>
    %c0_6 = arith.constant 0 : index
    %c0_7 = arith.constant 0 : index
    %13 = vector.load %arg5[%c0_6, %c0_7] : memref<1x32xf32, #tpu.memory_space<vmem>>, vector<1x32xf32>
    %cst_8 = arith.constant 0.000000e+00 : f32
    %14 = vector.broadcast %cst_8 : f32 to vector<8x32xf32>
    %cst_9 = arith.constant 0.000000e+00 : f32
    %15 = vector.broadcast %cst_9 : f32 to vector<8x32xf32>
    %16 = vector.extract_strided_slice %6 {offsets = [0, 0], sizes = [8, 128], strides = [1, 1]} : vector<64x128xf32> to vector<8x128xf32>
    %c0_10 = arith.constant 0 : index
    %c0_11 = arith.constant 0 : index
    %17 = vector.load %arg3[%c0_10, %c0_11] : memref<32x128xf32, #tpu.memory_space<vmem>>, vector<32x128xf32>
    %cst_12 = arith.constant dense<0.000000e+00> : vector<8x128xf32>
    %18 = tpu.matmul %14, %17, %cst_12 {dimension_numbers = #tpu.dot_dimension_numbers<[1], [0], [0], [1], [0, 0, 1, 1], [], []>} : vector<8x32xf32>, vector<32x128xf32>, vector<8x128xf32> -> vector<8x128xf32>
    %19 = arith.addf %16, %18 : vector<8x128xf32>
    %20 = math.tanh %19 : vector<8x128xf32>
    %21 = arith.negf %19 : vector<8x128xf32>
    %22 = math.exp %21 : vector<8x128xf32>
    %cst_13 = arith.constant 1.000000e+00 : f32
    %23 = vector.broadcast %cst_13 : f32 to vector<8x128xf32>
    %24 = arith.addf %23, %22 : vector<8x128xf32>
    %25 = arith.divf %23, %24 : vector<8x128xf32>
    %26 = arith.select %12, %20, %25 : vector<8x128xi1>, vector<8x128xf32>
    %27 = vector.extract_strided_slice %26 {offsets = [0, 0], sizes = [8, 32], strides = [1, 1]} : vector<8x128xf32> to vector<8x32xf32>
    %28 = vector.extract_strided_slice %26 {offsets = [0, 32], sizes = [8, 32], strides = [1, 1]} : vector<8x128xf32> to vector<8x32xf32>
    %29 = vector.extract_strided_slice %26 {offsets = [0, 64], sizes = [8, 32], strides = [1, 1]} : vector<8x128xf32> to vector<8x32xf32>
    %30 = vector.extract_strided_slice %26 {offsets = [0, 96], sizes = [8, 32], strides = [1, 1]} : vector<8x128xf32> to vector<8x32xf32>
    %31 = arith.mulf %28, %15 : vector<8x32xf32>
    %32 = arith.mulf %27, %29 : vector<8x32xf32>
    %33 = arith.addf %31, %32 : vector<8x32xf32>
    %34 = math.tanh %33 : vector<8x32xf32>
    %35 = arith.mulf %30, %34 : vector<8x32xf32>
    %36 = vector.broadcast %13 : vector<1x32xf32> to vector<8x32xf32>
    %37 = arith.mulf %35, %36 : vector<8x32xf32>
    %cst_14 = arith.constant dense<0.000000e+00> : vector<8xf32>
    %38 = vector.multi_reduction <add>, %37, %cst_14 [1] : vector<8x32xf32> to vector<8xf32>
    %39 = vector.shape_cast %38 : vector<8xf32> to vector<8x1xf32>
    %40 = vector.extract_strided_slice %6 {offsets = [8, 0], sizes = [8, 128], strides = [1, 1]} : vector<64x128xf32> to vector<8x128xf32>
    %c0_15 = arith.constant 0 : index
    %c0_16 = arith.constant 0 : index
    %41 = vector.load %arg3[%c0_15, %c0_16] : memref<32x128xf32, #tpu.memory_space<vmem>>, vector<32x128xf32>
    %cst_17 = arith.constant dense<0.000000e+00> : vector<8x128xf32>
    %42 = tpu.matmul %35, %41, %cst_17 {dimension_numbers = #tpu.dot_dimension_numbers<[1], [0], [0], [1], [0, 0, 1, 1], [], []>} : vector<8x32xf32>, vector<32x128xf32>, vector<8x128xf32> -> vector<8x128xf32>
    %43 = arith.addf %40, %42 : vector<8x128xf32>
    %44 = math.tanh %43 : vector<8x128xf32>
    %45 = arith.negf %43 : vector<8x128xf32>
    %46 = math.exp %45 : vector<8x128xf32>
    %cst_18 = arith.constant 1.000000e+00 : f32
    %47 = vector.broadcast %cst_18 : f32 to vector<8x128xf32>
    %48 = arith.addf %47, %46 : vector<8x128xf32>
    %49 = arith.divf %47, %48 : vector<8x128xf32>
    %50 = arith.select %12, %44, %49 : vector<8x128xi1>, vector<8x128xf32>
    %51 = vector.extract_strided_slice %50 {offsets = [0, 0], sizes = [8, 32], strides = [1, 1]} : vector<8x128xf32> to vector<8x32xf32>
    %52 = vector.extract_strided_slice %50 {offsets = [0, 32], sizes = [8, 32], strides = [1, 1]} : vector<8x128xf32> to vector<8x32xf32>
    %53 = vector.extract_strided_slice %50 {offsets = [0, 64], sizes = [8, 32], strides = [1, 1]} : vector<8x128xf32> to vector<8x32xf32>
    %54 = vector.extract_strided_slice %50 {offsets = [0, 96], sizes = [8, 32], strides = [1, 1]} : vector<8x128xf32> to vector<8x32xf32>
    %55 = arith.mulf %52, %33 : vector<8x32xf32>
    %56 = arith.mulf %51, %53 : vector<8x32xf32>
    %57 = arith.addf %55, %56 : vector<8x32xf32>
    %58 = math.tanh %57 : vector<8x32xf32>
    %59 = arith.mulf %54, %58 : vector<8x32xf32>
    %60 = vector.broadcast %13 : vector<1x32xf32> to vector<8x32xf32>
    %61 = arith.mulf %59, %60 : vector<8x32xf32>
    %cst_19 = arith.constant dense<0.000000e+00> : vector<8xf32>
    %62 = vector.multi_reduction <add>, %61, %cst_19 [1] : vector<8x32xf32> to vector<8xf32>
    %63 = vector.shape_cast %62 : vector<8xf32> to vector<8x1xf32>
    %64 = vector.extract_strided_slice %6 {offsets = [16, 0], sizes = [8, 128], strides = [1, 1]} : vector<64x128xf32> to vector<8x128xf32>
    %c0_20 = arith.constant 0 : index
    %c0_21 = arith.constant 0 : index
    %65 = vector.load %arg3[%c0_20, %c0_21] : memref<32x128xf32, #tpu.memory_space<vmem>>, vector<32x128xf32>
    %cst_22 = arith.constant dense<0.000000e+00> : vector<8x128xf32>
    %66 = tpu.matmul %59, %65, %cst_22 {dimension_numbers = #tpu.dot_dimension_numbers<[1], [0], [0], [1], [0, 0, 1, 1], [], []>} : vector<8x32xf32>, vector<32x128xf32>, vector<8x128xf32> -> vector<8x128xf32>
    %67 = arith.addf %64, %66 : vector<8x128xf32>
    %68 = math.tanh %67 : vector<8x128xf32>
    %69 = arith.negf %67 : vector<8x128xf32>
    %70 = math.exp %69 : vector<8x128xf32>
    %cst_23 = arith.constant 1.000000e+00 : f32
    %71 = vector.broadcast %cst_23 : f32 to vector<8x128xf32>
    %72 = arith.addf %71, %70 : vector<8x128xf32>
    %73 = arith.divf %71, %72 : vector<8x128xf32>
    %74 = arith.select %12, %68, %73 : vector<8x128xi1>, vector<8x128xf32>
    %75 = vector.extract_strided_slice %74 {offsets = [0, 0], sizes = [8, 32], strides = [1, 1]} : vector<8x128xf32> to vector<8x32xf32>
    %76 = vector.extract_strided_slice %74 {offsets = [0, 32], sizes = [8, 32], strides = [1, 1]} : vector<8x128xf32> to vector<8x32xf32>
    %77 = vector.extract_strided_slice %74 {offsets = [0, 64], sizes = [8, 32], strides = [1, 1]} : vector<8x128xf32> to vector<8x32xf32>
    %78 = vector.extract_strided_slice %74 {offsets = [0, 96], sizes = [8, 32], strides = [1, 1]} : vector<8x128xf32> to vector<8x32xf32>
    %79 = arith.mulf %76, %57 : vector<8x32xf32>
    %80 = arith.mulf %75, %77 : vector<8x32xf32>
    %81 = arith.addf %79, %80 : vector<8x32xf32>
    %82 = math.tanh %81 : vector<8x32xf32>
    %83 = arith.mulf %78, %82 : vector<8x32xf32>
    %84 = vector.broadcast %13 : vector<1x32xf32> to vector<8x32xf32>
    %85 = arith.mulf %83, %84 : vector<8x32xf32>
    %cst_24 = arith.constant dense<0.000000e+00> : vector<8xf32>
    %86 = vector.multi_reduction <add>, %85, %cst_24 [1] : vector<8x32xf32> to vector<8xf32>
    %87 = vector.shape_cast %86 : vector<8xf32> to vector<8x1xf32>
    %88 = vector.extract_strided_slice %6 {offsets = [24, 0], sizes = [8, 128], strides = [1, 1]} : vector<64x128xf32> to vector<8x128xf32>
    %c0_25 = arith.constant 0 : index
    %c0_26 = arith.constant 0 : index
    %89 = vector.load %arg3[%c0_25, %c0_26] : memref<32x128xf32, #tpu.memory_space<vmem>>, vector<32x128xf32>
    %cst_27 = arith.constant dense<0.000000e+00> : vector<8x128xf32>
    %90 = tpu.matmul %83, %89, %cst_27 {dimension_numbers = #tpu.dot_dimension_numbers<[1], [0], [0], [1], [0, 0, 1, 1], [], []>} : vector<8x32xf32>, vector<32x128xf32>, vector<8x128xf32> -> vector<8x128xf32>
    %91 = arith.addf %88, %90 : vector<8x128xf32>
    %92 = math.tanh %91 : vector<8x128xf32>
    %93 = arith.negf %91 : vector<8x128xf32>
    %94 = math.exp %93 : vector<8x128xf32>
    %cst_28 = arith.constant 1.000000e+00 : f32
    %95 = vector.broadcast %cst_28 : f32 to vector<8x128xf32>
    %96 = arith.addf %95, %94 : vector<8x128xf32>
    %97 = arith.divf %95, %96 : vector<8x128xf32>
    %98 = arith.select %12, %92, %97 : vector<8x128xi1>, vector<8x128xf32>
    %99 = vector.extract_strided_slice %98 {offsets = [0, 0], sizes = [8, 32], strides = [1, 1]} : vector<8x128xf32> to vector<8x32xf32>
    %100 = vector.extract_strided_slice %98 {offsets = [0, 32], sizes = [8, 32], strides = [1, 1]} : vector<8x128xf32> to vector<8x32xf32>
    %101 = vector.extract_strided_slice %98 {offsets = [0, 64], sizes = [8, 32], strides = [1, 1]} : vector<8x128xf32> to vector<8x32xf32>
    %102 = vector.extract_strided_slice %98 {offsets = [0, 96], sizes = [8, 32], strides = [1, 1]} : vector<8x128xf32> to vector<8x32xf32>
    %103 = arith.mulf %100, %81 : vector<8x32xf32>
    %104 = arith.mulf %99, %101 : vector<8x32xf32>
    %105 = arith.addf %103, %104 : vector<8x32xf32>
    %106 = math.tanh %105 : vector<8x32xf32>
    %107 = arith.mulf %102, %106 : vector<8x32xf32>
    %108 = vector.broadcast %13 : vector<1x32xf32> to vector<8x32xf32>
    %109 = arith.mulf %107, %108 : vector<8x32xf32>
    %cst_29 = arith.constant dense<0.000000e+00> : vector<8xf32>
    %110 = vector.multi_reduction <add>, %109, %cst_29 [1] : vector<8x32xf32> to vector<8xf32>
    %111 = vector.shape_cast %110 : vector<8xf32> to vector<8x1xf32>
    %112 = vector.extract_strided_slice %6 {offsets = [32, 0], sizes = [8, 128], strides = [1, 1]} : vector<64x128xf32> to vector<8x128xf32>
    %c0_30 = arith.constant 0 : index
    %c0_31 = arith.constant 0 : index
    %113 = vector.load %arg3[%c0_30, %c0_31] : memref<32x128xf32, #tpu.memory_space<vmem>>, vector<32x128xf32>
    %cst_32 = arith.constant dense<0.000000e+00> : vector<8x128xf32>
    %114 = tpu.matmul %107, %113, %cst_32 {dimension_numbers = #tpu.dot_dimension_numbers<[1], [0], [0], [1], [0, 0, 1, 1], [], []>} : vector<8x32xf32>, vector<32x128xf32>, vector<8x128xf32> -> vector<8x128xf32>
    %115 = arith.addf %112, %114 : vector<8x128xf32>
    %116 = math.tanh %115 : vector<8x128xf32>
    %117 = arith.negf %115 : vector<8x128xf32>
    %118 = math.exp %117 : vector<8x128xf32>
    %cst_33 = arith.constant 1.000000e+00 : f32
    %119 = vector.broadcast %cst_33 : f32 to vector<8x128xf32>
    %120 = arith.addf %119, %118 : vector<8x128xf32>
    %121 = arith.divf %119, %120 : vector<8x128xf32>
    %122 = arith.select %12, %116, %121 : vector<8x128xi1>, vector<8x128xf32>
    %123 = vector.extract_strided_slice %122 {offsets = [0, 0], sizes = [8, 32], strides = [1, 1]} : vector<8x128xf32> to vector<8x32xf32>
    %124 = vector.extract_strided_slice %122 {offsets = [0, 32], sizes = [8, 32], strides = [1, 1]} : vector<8x128xf32> to vector<8x32xf32>
    %125 = vector.extract_strided_slice %122 {offsets = [0, 64], sizes = [8, 32], strides = [1, 1]} : vector<8x128xf32> to vector<8x32xf32>
    %126 = vector.extract_strided_slice %122 {offsets = [0, 96], sizes = [8, 32], strides = [1, 1]} : vector<8x128xf32> to vector<8x32xf32>
    %127 = arith.mulf %124, %105 : vector<8x32xf32>
    %128 = arith.mulf %123, %125 : vector<8x32xf32>
    %129 = arith.addf %127, %128 : vector<8x32xf32>
    %130 = math.tanh %129 : vector<8x32xf32>
    %131 = arith.mulf %126, %130 : vector<8x32xf32>
    %132 = vector.broadcast %13 : vector<1x32xf32> to vector<8x32xf32>
    %133 = arith.mulf %131, %132 : vector<8x32xf32>
    %cst_34 = arith.constant dense<0.000000e+00> : vector<8xf32>
    %134 = vector.multi_reduction <add>, %133, %cst_34 [1] : vector<8x32xf32> to vector<8xf32>
    %135 = vector.shape_cast %134 : vector<8xf32> to vector<8x1xf32>
    %136 = vector.extract_strided_slice %6 {offsets = [40, 0], sizes = [8, 128], strides = [1, 1]} : vector<64x128xf32> to vector<8x128xf32>
    %c0_35 = arith.constant 0 : index
    %c0_36 = arith.constant 0 : index
    %137 = vector.load %arg3[%c0_35, %c0_36] : memref<32x128xf32, #tpu.memory_space<vmem>>, vector<32x128xf32>
    %cst_37 = arith.constant dense<0.000000e+00> : vector<8x128xf32>
    %138 = tpu.matmul %131, %137, %cst_37 {dimension_numbers = #tpu.dot_dimension_numbers<[1], [0], [0], [1], [0, 0, 1, 1], [], []>} : vector<8x32xf32>, vector<32x128xf32>, vector<8x128xf32> -> vector<8x128xf32>
    %139 = arith.addf %136, %138 : vector<8x128xf32>
    %140 = math.tanh %139 : vector<8x128xf32>
    %141 = arith.negf %139 : vector<8x128xf32>
    %142 = math.exp %141 : vector<8x128xf32>
    %cst_38 = arith.constant 1.000000e+00 : f32
    %143 = vector.broadcast %cst_38 : f32 to vector<8x128xf32>
    %144 = arith.addf %143, %142 : vector<8x128xf32>
    %145 = arith.divf %143, %144 : vector<8x128xf32>
    %146 = arith.select %12, %140, %145 : vector<8x128xi1>, vector<8x128xf32>
    %147 = vector.extract_strided_slice %146 {offsets = [0, 0], sizes = [8, 32], strides = [1, 1]} : vector<8x128xf32> to vector<8x32xf32>
    %148 = vector.extract_strided_slice %146 {offsets = [0, 32], sizes = [8, 32], strides = [1, 1]} : vector<8x128xf32> to vector<8x32xf32>
    %149 = vector.extract_strided_slice %146 {offsets = [0, 64], sizes = [8, 32], strides = [1, 1]} : vector<8x128xf32> to vector<8x32xf32>
    %150 = vector.extract_strided_slice %146 {offsets = [0, 96], sizes = [8, 32], strides = [1, 1]} : vector<8x128xf32> to vector<8x32xf32>
    %151 = arith.mulf %148, %129 : vector<8x32xf32>
    %152 = arith.mulf %147, %149 : vector<8x32xf32>
    %153 = arith.addf %151, %152 : vector<8x32xf32>
    %154 = math.tanh %153 : vector<8x32xf32>
    %155 = arith.mulf %150, %154 : vector<8x32xf32>
    %156 = vector.broadcast %13 : vector<1x32xf32> to vector<8x32xf32>
    %157 = arith.mulf %155, %156 : vector<8x32xf32>
    %cst_39 = arith.constant dense<0.000000e+00> : vector<8xf32>
    %158 = vector.multi_reduction <add>, %157, %cst_39 [1] : vector<8x32xf32> to vector<8xf32>
    %159 = vector.shape_cast %158 : vector<8xf32> to vector<8x1xf32>
    %160 = vector.extract_strided_slice %6 {offsets = [48, 0], sizes = [8, 128], strides = [1, 1]} : vector<64x128xf32> to vector<8x128xf32>
    %c0_40 = arith.constant 0 : index
    %c0_41 = arith.constant 0 : index
    %161 = vector.load %arg3[%c0_40, %c0_41] : memref<32x128xf32, #tpu.memory_space<vmem>>, vector<32x128xf32>
    %cst_42 = arith.constant dense<0.000000e+00> : vector<8x128xf32>
    %162 = tpu.matmul %155, %161, %cst_42 {dimension_numbers = #tpu.dot_dimension_numbers<[1], [0], [0], [1], [0, 0, 1, 1], [], []>} : vector<8x32xf32>, vector<32x128xf32>, vector<8x128xf32> -> vector<8x128xf32>
    %163 = arith.addf %160, %162 : vector<8x128xf32>
    %164 = math.tanh %163 : vector<8x128xf32>
    %165 = arith.negf %163 : vector<8x128xf32>
    %166 = math.exp %165 : vector<8x128xf32>
    %cst_43 = arith.constant 1.000000e+00 : f32
    %167 = vector.broadcast %cst_43 : f32 to vector<8x128xf32>
    %168 = arith.addf %167, %166 : vector<8x128xf32>
    %169 = arith.divf %167, %168 : vector<8x128xf32>
    %170 = arith.select %12, %164, %169 : vector<8x128xi1>, vector<8x128xf32>
    %171 = vector.extract_strided_slice %170 {offsets = [0, 0], sizes = [8, 32], strides = [1, 1]} : vector<8x128xf32> to vector<8x32xf32>
    %172 = vector.extract_strided_slice %170 {offsets = [0, 32], sizes = [8, 32], strides = [1, 1]} : vector<8x128xf32> to vector<8x32xf32>
    %173 = vector.extract_strided_slice %170 {offsets = [0, 64], sizes = [8, 32], strides = [1, 1]} : vector<8x128xf32> to vector<8x32xf32>
    %174 = vector.extract_strided_slice %170 {offsets = [0, 96], sizes = [8, 32], strides = [1, 1]} : vector<8x128xf32> to vector<8x32xf32>
    %175 = arith.mulf %172, %153 : vector<8x32xf32>
    %176 = arith.mulf %171, %173 : vector<8x32xf32>
    %177 = arith.addf %175, %176 : vector<8x32xf32>
    %178 = math.tanh %177 : vector<8x32xf32>
    %179 = arith.mulf %174, %178 : vector<8x32xf32>
    %180 = vector.broadcast %13 : vector<1x32xf32> to vector<8x32xf32>
    %181 = arith.mulf %179, %180 : vector<8x32xf32>
    %cst_44 = arith.constant dense<0.000000e+00> : vector<8xf32>
    %182 = vector.multi_reduction <add>, %181, %cst_44 [1] : vector<8x32xf32> to vector<8xf32>
    %183 = vector.shape_cast %182 : vector<8xf32> to vector<8x1xf32>
    %184 = vector.extract_strided_slice %6 {offsets = [56, 0], sizes = [8, 128], strides = [1, 1]} : vector<64x128xf32> to vector<8x128xf32>
    %c0_45 = arith.constant 0 : index
    %c0_46 = arith.constant 0 : index
    %185 = vector.load %arg3[%c0_45, %c0_46] : memref<32x128xf32, #tpu.memory_space<vmem>>, vector<32x128xf32>
    %cst_47 = arith.constant dense<0.000000e+00> : vector<8x128xf32>
    %186 = tpu.matmul %179, %185, %cst_47 {dimension_numbers = #tpu.dot_dimension_numbers<[1], [0], [0], [1], [0, 0, 1, 1], [], []>} : vector<8x32xf32>, vector<32x128xf32>, vector<8x128xf32> -> vector<8x128xf32>
    %187 = arith.addf %184, %186 : vector<8x128xf32>
    %188 = math.tanh %187 : vector<8x128xf32>
    %189 = arith.negf %187 : vector<8x128xf32>
    %190 = math.exp %189 : vector<8x128xf32>
    %cst_48 = arith.constant 1.000000e+00 : f32
    %191 = vector.broadcast %cst_48 : f32 to vector<8x128xf32>
    %192 = arith.addf %191, %190 : vector<8x128xf32>
    %193 = arith.divf %191, %192 : vector<8x128xf32>
    %194 = arith.select %12, %188, %193 : vector<8x128xi1>, vector<8x128xf32>
    %195 = vector.extract_strided_slice %194 {offsets = [0, 0], sizes = [8, 32], strides = [1, 1]} : vector<8x128xf32> to vector<8x32xf32>
    %196 = vector.extract_strided_slice %194 {offsets = [0, 32], sizes = [8, 32], strides = [1, 1]} : vector<8x128xf32> to vector<8x32xf32>
    %197 = vector.extract_strided_slice %194 {offsets = [0, 64], sizes = [8, 32], strides = [1, 1]} : vector<8x128xf32> to vector<8x32xf32>
    %198 = vector.extract_strided_slice %194 {offsets = [0, 96], sizes = [8, 32], strides = [1, 1]} : vector<8x128xf32> to vector<8x32xf32>
    %199 = arith.mulf %196, %177 : vector<8x32xf32>
    %200 = arith.mulf %195, %197 : vector<8x32xf32>
    %201 = arith.addf %199, %200 : vector<8x32xf32>
    %202 = math.tanh %201 : vector<8x32xf32>
    %203 = arith.mulf %198, %202 : vector<8x32xf32>
    %204 = vector.broadcast %13 : vector<1x32xf32> to vector<8x32xf32>
    %205 = arith.mulf %203, %204 : vector<8x32xf32>
    %cst_49 = arith.constant dense<0.000000e+00> : vector<8xf32>
    %206 = vector.multi_reduction <add>, %205, %cst_49 [1] : vector<8x32xf32> to vector<8xf32>
    %207 = vector.shape_cast %206 : vector<8xf32> to vector<8x1xf32>
    %208 = tpu.concatenate %39, %63, %87, %111, %135, %159, %183, %207 in 1 : vector<8x1xf32>, vector<8x1xf32>, vector<8x1xf32>, vector<8x1xf32>, vector<8x1xf32>, vector<8x1xf32>, vector<8x1xf32>, vector<8x1xf32> -> vector<8x8xf32>
    %c0_50 = arith.constant 0 : index
    %c0_51 = arith.constant 0 : index
    %209 = vector.load %arg6[%c0_50, %c0_51] : memref<1x1xf32, #tpu.memory_space<vmem>>, vector<1x1xf32>
    %210 = vector.broadcast %209 : vector<1x1xf32> to vector<8x8xf32>
    %211 = arith.addf %208, %210 : vector<8x8xf32>
    %cst_52 = arith.constant dense<0xFF800000> : vector<8xf32>
    %212 = vector.multi_reduction <maximumf>, %211, %cst_52 [1] : vector<8x8xf32> to vector<8xf32>
    %213 = vector.shape_cast %212 : vector<8xf32> to vector<8x1xf32>
    %214 = vector.broadcast %213 : vector<8x1xf32> to vector<8x8xf32>
    %215 = arith.subf %211, %214 : vector<8x8xf32>
    %216 = math.exp %215 : vector<8x8xf32>
    %cst_53 = arith.constant dense<0.000000e+00> : vector<8xf32>
    %217 = vector.multi_reduction <add>, %216, %cst_53 [1] : vector<8x8xf32> to vector<8xf32>
    %218 = vector.shape_cast %217 : vector<8xf32> to vector<8x1xf32>
    %219 = tpu.reciprocal %218 {approx = true} : vector<8x1xf32> -> vector<8x1xf32>
    %220 = vector.broadcast %219 : vector<8x1xf32> to vector<8x8xf32>
    %221 = arith.mulf %216, %220 : vector<8x8xf32>
    %c0_54 = arith.constant 0 : index
    %c0_55 = arith.constant 0 : index
    %222 = vector.load %arg14[%c0_54, %c0_55] : memref<8x8xf32, #tpu.memory_space<vmem>>, vector<8x8xf32>
    tpu.vector_store %arg14[%c0_54, %c0_55], %221 {strides = array<i32>} : memref<8x8xf32, #tpu.memory_space<vmem>>, vector<8x8xf32>,
    %223 = vector.extract_strided_slice %221 {offsets = [0, 7], sizes = [8, 1], strides = [1, 1]} : vector<8x8xf32> to vector<8x1xf32>
    %224 = vector.broadcast %223 : vector<8x1xf32> to vector<8x32xf32>
    %225 = arith.mulf %203, %224 : vector<8x32xf32>
    %c0_56 = arith.constant 0 : index
    %c0_57 = arith.constant 0 : index
    %226 = vector.load %arg7[%c0_56, %c0_57] : memref<32x64xf32, #tpu.memory_space<vmem>>, vector<32x64xf32>
    %cst_58 = arith.constant dense<0.000000e+00> : vector<8x64xf32>
    %227 = tpu.matmul %225, %226, %cst_58 {dimension_numbers = #tpu.dot_dimension_numbers<[1], [0], [0], [1], [0, 0, 1, 1], [], []>} : vector<8x32xf32>, vector<32x64xf32>, vector<8x64xf32> -> vector<8x64xf32>
    %c0_59 = arith.constant 0 : index
    %c0_60 = arith.constant 0 : index
    %228 = vector.load %arg8[%c0_59, %c0_60] : memref<1x64xf32, #tpu.memory_space<vmem>>, vector<1x64xf32>
    %229 = vector.broadcast %228 : vector<1x64xf32> to vector<8x64xf32>
    %230 = arith.addf %227, %229 : vector<8x64xf32>
    %cst_61 = arith.constant 0.000000e+00 : f32
    %231 = vector.broadcast %cst_61 : f32 to vector<8x64xf32>
    %232 = arith.maximumf %230, %231 : vector<8x64xf32>
    %c0_62 = arith.constant 0 : index
    %c0_63 = arith.constant 0 : index
    %233 = vector.load %arg9[%c0_62, %c0_63] : memref<64x32xf32, #tpu.memory_space<vmem>>, vector<64x32xf32>
    %cst_64 = arith.constant dense<0.000000e+00> : vector<8x32xf32>
    %234 = tpu.matmul %232, %233, %cst_64 {dimension_numbers = #tpu.dot_dimension_numbers<[1], [0], [0], [1], [0, 0, 1, 1], [], []>} : vector<8x64xf32>, vector<64x32xf32>, vector<8x32xf32> -> vector<8x32xf32>
    %c0_65 = arith.constant 0 : index
    %c0_66 = arith.constant 0 : index
    %235 = vector.load %arg10[%c0_65, %c0_66] : memref<1x32xf32, #tpu.memory_space<vmem>>, vector<1x32xf32>
    %236 = vector.broadcast %235 : vector<1x32xf32> to vector<8x32xf32>
    %237 = arith.addf %234, %236 : vector<8x32xf32>
    %cst_67 = arith.constant 0.000000e+00 : f32
    %238 = vector.broadcast %cst_67 : f32 to vector<8x32xf32>
    %239 = arith.maximumf %237, %238 : vector<8x32xf32>
    %c0_68 = arith.constant 0 : index
    %c0_69 = arith.constant 0 : index
    %240 = vector.load %arg11[%c0_68, %c0_69] : memref<32x4xf32, #tpu.memory_space<vmem>>, vector<32x4xf32>
    %cst_70 = arith.constant dense<0.000000e+00> : vector<8x4xf32>
    %241 = tpu.matmul %239, %240, %cst_70 {dimension_numbers = #tpu.dot_dimension_numbers<[1], [0], [0], [1], [0, 0, 1, 1], [], []>} : vector<8x32xf32>, vector<32x4xf32>, vector<8x4xf32> -> vector<8x4xf32>
    %c0_71 = arith.constant 0 : index
    %c0_72 = arith.constant 0 : index
    %242 = vector.load %arg12[%c0_71, %c0_72] : memref<1x4xf32, #tpu.memory_space<vmem>>, vector<1x4xf32>
    %243 = vector.broadcast %242 : vector<1x4xf32> to vector<8x4xf32>
    %244 = arith.addf %241, %243 : vector<8x4xf32>
    %cst_73 = arith.constant dense<0xFF800000> : vector<8xf32>
    %245 = vector.multi_reduction <maximumf>, %244, %cst_73 [1] : vector<8x4xf32> to vector<8xf32>
    %246 = vector.shape_cast %245 : vector<8xf32> to vector<8x1xf32>
    %247 = vector.broadcast %246 : vector<8x1xf32> to vector<8x4xf32>
    %248 = arith.subf %244, %247 : vector<8x4xf32>
    %249 = math.exp %248 : vector<8x4xf32>
    %cst_74 = arith.constant dense<0.000000e+00> : vector<8xf32>
    %250 = vector.multi_reduction <add>, %249, %cst_74 [1] : vector<8x4xf32> to vector<8xf32>
    %251 = vector.shape_cast %250 : vector<8xf32> to vector<8x1xf32>
    %252 = tpu.reciprocal %251 {approx = true} : vector<8x1xf32> -> vector<8x1xf32>
    %253 = vector.broadcast %252 : vector<8x1xf32> to vector<8x4xf32>
    %254 = arith.mulf %249, %253 : vector<8x4xf32>
    %c0_75 = arith.constant 0 : index
    %c0_76 = arith.constant 0 : index
    %255 = vector.load %arg13[%c0_75, %c0_76] : memref<8x4xf32, #tpu.memory_space<vmem>>, vector<8x4xf32>
    tpu.vector_store %arg13[%c0_75, %c0_76], %254 {strides = array<i32>} : memref<8x4xf32, #tpu.memory_space<vmem>>, vector<8x4xf32>,
    return
  }
  func.func @transform_0(%arg0: i32) -> (i32, i32, i32) {
    %c0_i32 = arith.constant 0 : i32
    %c0_i32_0 = arith.constant 0 : i32
    %c0_i32_1 = arith.constant 0 : i32
    %c0_i32_2 = arith.constant 0 : i32
    return %c0_i32, %c0_i32_0, %c0_i32_1 : i32, i32, i32
  }
  func.func @transform_1(%arg0: i32) -> (i32, i32) {
    %c0_i32 = arith.constant 0 : i32
    %c0_i32_0 = arith.constant 0 : i32
    %c0_i32_1 = arith.constant 0 : i32
    return %c0_i32, %c0_i32_0 : i32, i32
  }
  func.func @transform_2(%arg0: i32) -> (i32, i32) {
    %c0_i32 = arith.constant 0 : i32
    %c0_i32_0 = arith.constant 0 : i32
    %c0_i32_1 = arith.constant 0 : i32
    return %c0_i32, %c0_i32_0 : i32, i32
  }
  func.func @transform_3(%arg0: i32) -> (i32, i32) {
    %c0_i32 = arith.constant 0 : i32
    %c0_i32_0 = arith.constant 0 : i32
    %c0_i32_1 = arith.constant 0 : i32
    return %c0_i32, %c0_i32_0 : i32, i32
  }
  func.func @transform_4(%arg0: i32) -> (i32, i32) {
    %c0_i32 = arith.constant 0 : i32
    %c0_i32_0 = arith.constant 0 : i32
    %c0_i32_1 = arith.constant 0 : i32
    return %c0_i32, %c0_i32_0 : i32, i32
  }
  func.func @transform_5(%arg0: i32) -> (i32, i32) {
    %c0_i32 = arith.constant 0 : i32
    %c0_i32_0 = arith.constant 0 : i32
    %c0_i32_1 = arith.constant 0 : i32
    return %c0_i32, %c0_i32_0 : i32, i32
  }
  func.func @transform_6(%arg0: i32) -> (i32, i32) {
    %c0_i32 = arith.constant 0 : i32
    %c0_i32_0 = arith.constant 0 : i32
    %c0_i32_1 = arith.constant 0 : i32
    return %c0_i32, %c0_i32_0 : i32, i32
  }
  func.func @transform_7(%arg0: i32) -> (i32, i32) {
    %c0_i32 = arith.constant 0 : i32
    %c0_i32_0 = arith.constant 0 : i32
    %c0_i32_1 = arith.constant 0 : i32
    return %c0_i32, %c0_i32_0 : i32, i32
  }
  func.func @transform_8(%arg0: i32) -> (i32, i32) {
    %c0_i32 = arith.constant 0 : i32
    %c0_i32_0 = arith.constant 0 : i32
    %c0_i32_1 = arith.constant 0 : i32
    return %c0_i32, %c0_i32_0 : i32, i32
  }
  func.func @transform_9(%arg0: i32) -> (i32, i32) {
    %c0_i32 = arith.constant 0 : i32
    %c0_i32_0 = arith.constant 0 : i32
    %c0_i32_1 = arith.constant 0 : i32
    return %c0_i32, %c0_i32_0 : i32, i32
  }
  func.func @transform_10(%arg0: i32) -> (i32, i32) {
    %c0_i32 = arith.constant 0 : i32
    %c0_i32_0 = arith.constant 0 : i32
    %c0_i32_1 = arith.constant 0 : i32
    return %c0_i32, %c0_i32_0 : i32, i32
  }
  func.func @transform_11(%arg0: i32) -> (i32, i32) {
    %c0_i32 = arith.constant 0 : i32
    %c0_i32_0 = arith.constant 0 : i32
    %c0_i32_1 = arith.constant 0 : i32
    return %c0_i32, %c0_i32_0 : i32, i32
  }
  func.func @transform_12(%arg0: i32) -> (i32, i32) {
    %c0_i32 = arith.constant 0 : i32
    %c0_i32_0 = arith.constant 0 : i32
    %c0_i32_1 = arith.constant 0 : i32
    return %c0_i32, %c0_i32_0 : i32, i32
  }
  func.func @transform_13(%arg0: i32) -> (i32, i32) {
    %c0_i32 = arith.constant 0 : i32
    %c0_i32_0 = arith.constant 0 : i32
    %c0_i32_1 = arith.constant 0 : i32
    return %c0_i32, %c0_i32_0 : i32, i32
  }
}

</mosaic_0001>

<bundles_post_ra>
// kernel: tpu_custom_call.1
= control target key start
LH: loop header
LB: loop body
LE: loop exit
PB: predicated region body
PF: predicated region fallthrough
CT: control target
= control target key end

     0   :  { %s2302_s0 = inlined_call_operand.vmem [shape: f32[8,8,16], index: 0, kind: input, shape index: {}]   ;;  %s2303_s1 = inlined_call_operand.vmem [shape: f32[16,128], index: 1, kind: input, shape index: {}]   ;;  %s2304_s2 = inlined_call_operand.vmem [shape: f32[32,128], index: 2, kind: input, shape index: {}]   ;;  %s2305_s3 = inlined_call_operand.vmem [shape: f32[1,128], index: 3, kind: input, shape index: {}]   ;;  %s2306_s4 = inlined_call_operand.vmem [shape: f32[1,32], index: 4, kind: input, shape index: {}]   ;;  %s2307_s5 = inlined_call_operand.<no memory space> [shape: f32[1,1], index: 5, kind: input, shape index: {}]   ;;  %s2308_s6 = inlined_call_operand.hbm [shape: f32[32,64], index: 6, kind: input, shape index: {}]   ;;  %s2309_s7 = inlined_call_operand.vmem [shape: f32[1,64], index: 7, kind: input, shape index: {}]   ;;  %s2310_s8 = inlined_call_operand.vmem [shape: f32[64,32], index: 8, kind: input, shape index: {}]   ;;  %s2311_s9 = inlined_call_operand.vmem [shape: f32[1,32], index: 9, kind: input, shape index: {}]   ;;  %s2312_s10 = inlined_call_operand.vmem [shape: f32[32,4], index: 10, kind: input, shape index: {}]   ;;  %s2313_s11 = inlined_call_operand.vmem [shape: f32[1,4], index: 11, kind: input, shape index: {}]   ;;  %s2314_s12 = inlined_call_operand.vmem [shape: f32[8,4], index: 12, kind: output, shape index: {0}]   ;;  %s2315_s13 = inlined_call_operand.hbm [shape: f32[8,8], index: 13, kind: output, shape index: {1}]  }
   0x1   :  { %v19_v0 = vstv %s2307_s5 }
   0x2   :  { %20 = vst [vmem:[#allocation2] sm:$0x1] %v19_v0 }
   0x3   :  { %21 = vsyncpa [#allocation4], 0 }
   0x4   :  { %22 = vsyncpa [#allocation5], 0  ;;  %s1888_s27 = smov [#allocation3]   ;;  %s1840_s14 = scalar_lea.hbm %s2308_s6, 512 }
   0x5   :  { %s40_s28 = sshll.u32 %s1888_s27, 4  ;;  %p1841_p0 = scmp.ne.s32.totalorder %s2308_s6, %s1840_s14  ;;  %s41_s28 = int_to_ptr.vmem [resolvable:$true] %s40_s28 }
   0x6   :  { %p1844_p1 = scmp.lt.u32.totalorder %s1840_s14, %s2308_s6 }
   0x8   :  { %p1846_p2 = pnand %p1844_p1, %p1841_p0 }
   0xa   :  { %1849 = shalt.err (!%p1846_p2)
}
   0xb   :  { %s1850_s5 = scalar_lea.vmem %s41_s28, 512  ;;  %p1855_p4 = scmp.lt.s32.totalorder %s41_s28, %s41_s28 }
   0xc   :  { %p1851_p3 = scmp.ne.s32.totalorder %s41_s28, %s1850_s5  ;;  %p1856_p5 = scmp.lt.s32.totalorder %s1850_s5, %s1850_s5 }
   0xe   :  { %p1857_p6 = por %p1856_p5, %p1855_p4 }
  0x10   :  { %p1858_p7 = pnand %p1857_p6, %p1851_p3 }
  0x12   :  { %1861 = shalt.err (!%p1858_p7)
}
  0x13   :  { %s1889_s19 = smov 128   ;;  %s1890_s20 = smov 8  }
  0x14   :  { %46 = dma.hbm_to_vmem [thread:$0]  %s2308_s6, 512, %s41_s28, [#allocation4], %s1889_s19, %s1889_s19, %s1890_s20  }
  0x15   :  { %1884 = dma.done.wait [#allocation4], 512  }
  0x16   :  { %1885 = vsyncadd [#allocation4], 4294966784  ;;  %v1891_v1 = vmov 0.0|0.0   ;;  %vm1892_vm0 = vmmov 0   ;;  %v1893_v2 = vmov 0.0   ;;  %vm77_vm1 = vcmask 130048  }
  0x17   :  { %1682 = vmatprep.subr.bf16.mxu1 %v1891_v1  ;;  %1557 = vmatprep.mubr.msk.f32.mxu1 %vm1892_vm0, %v1893_v2  ;;  %v68_v3 = vld [vmem:[%s2303_s1] sm:$0xff]  ;;  %v69_v4 = vld [vmem:[%s2303_s1 + $0x8] sm:$0xff]  ;;  %v215_v10 = vld [vmem:[%s2304_s2 + $0x10] sm:$0xff]  ;;  %v207_v23 = vlaneseq  ;;  %s1895_s20 = smov 32   ;;  %vm217_vm5 = vcmask 261120   ;;  %s1896_s16 = smov 96  }
  0x18   :  { %v213_v5 = vld [vmem:[%s2304_s2] sm:$0xff]  ;;  %v1678_v6 = vpack.c.bf16 %v69_v4, %v68_v3  ;;  %v214_v7 = vld [vmem:[%s2304_s2 + $0x8] sm:$0xff]  ;;  %v216_v11 = vld [vmem:[%s2304_s2 + $0x18] sm:$0xff]  ;;  %vm1096_vm6 = vcmask 7168   ;;  %vm1098_vm7 = vcmask 15360   ;;  %vm1100_vm8 = vcmask 23552  }
  0x19   :  { %v60_v8 = vld [vmem:[%s2302_s0] sm:$0xff]  ;;  %v2003_v9 = vpack.c.bf16 %v214_v7, %v213_v5  ;;  %v61_v12 = vld [vmem:[%s2302_s0 + $0x8] sm:$0xff]  ;;  %v2016_v13 = vpack.c.bf16 %v216_v11, %v215_v10  ;;  %v208_v25 = vand.u32 127, %v207_v23  ;;  %v62_v54 = vld [vmem:[%s2302_s0 + $0x10] sm:$0xff]  ;;  %vm1102_vm9 = vcmask 31744  }
  0x1a   :  { %1537 = vmatprep.mubr.msk.f32.mxu0 %vm77_vm1, %v60_v8  ;;  %1679 = vmatprep.subr.bf16.mxu0 %v1678_v6  ;;  %v2037_v14 = vld [vmem:[%s2305_s3] ss:$0 sm:$0xff]  ;;  %s1894_s3 = smov 64   ;;  %v63_v55 = vld [vmem:[%s2302_s0 + $0x18] sm:$0xff]  ;;  %v65_v57 = vld [vmem:[%s2302_s0 + $0x28] sm:$0xff]  ;;  %vm1104_vm10 = vcmask 39936  }
  0x1b   :  { %1684 = vmatpush3.bf16.msra.mxu1 %v2003_v9  ;;  %1681 = vmatpush3.bf16.msra.mxu0 %v1678_v6  ;;  %vm209_vm2 = vcmp.ge.s32.totalorder %v208_v25, 64  ;;  %vm210_vm3 = vcmp.lt.s32.totalorder %v208_v25, 96  ;;  %v64_v56 = vld [vmem:[%s2302_s0 + $0x20] sm:$0xff]  ;;  %v66_v58 = vld [vmem:[%s2302_s0 + $0x30] sm:$0xff]  ;;  %v67_v59 = vld [vmem:[%s2302_s0 + $0x38] sm:$0xff]  ;;  %vm1106_vm11 = vcmask 48128  }
  0x1c   :  { %1685 = vmatprep.subr.bf16.mxu1 %v1891_v1  ;;  %1694 = vmatprep.subr.bf16.mxu0 %v1891_v1  ;;  %vm2040_vm4 = vmand %vm209_vm2, %vm210_vm3  ;;  %vm1108_vm12 = vcmask 56320   ;;  %vm1121_vm13 = vcmask 64512   ;;  %vm1242_vm14 = vcmask 523264  }
  0x1e   :  { %1538 = vmatmul.mubr.msk.f32.vlgmr.msra.gmra.mrb[0].mxu0 %vm77_vm1, %v61_v12 }
  0x1f   :  { %1687 = vmatpush3.bf16.msra.mxu1 %v2016_v13  ;;  %1696 = vmatpush3.bf16.msra.mxu0 %v2003_v9 }
  0x20   :  { %1688 = vmatprep.subr.bf16.mxu1 %v1891_v1  ;;  %1697 = vmatprep.subr.bf16.mxu0 %v1891_v1 }
  0x21   :  { %1540 = vmatprep.mubr.msk.f32.mxu0 %vm77_vm1, %v62_v54 }
  0x22   :  { %1558 = vmatmul.mubr.f32.vlgmr.msra.gmra.mrb[0].mxu1 %v1893_v2  ;;  %1541 = vmatmul.mubr.msk.f32.gmra.mrb[2].mxu0 %vm77_vm1, %v63_v55 }
  0x23   :  { %1690 = vmatpush3.bf16.msra.mxu1 %v2003_v9  ;;  %1568 = vmatprep.mubr.msk.f32.mxu1 %vm1892_vm0, %v1893_v2 }
  0x24   :  { %1691 = vmatprep.subr.bf16.mxu1 %v1891_v1  ;;  %1699 = vmatpush3.bf16.msra.mxu0 %v2016_v13 }
  0x25   :  { %1706 = vmatprep.subr.bf16.mxu0 %v1891_v1  ;;  %1543 = vmatprep.mubr.msk.f32.mxu0 %vm77_vm1, %v64_v56 }
  0x26   :  { %1544 = vmatmul.mubr.msk.f32.gmra.mrb[4].mxu0 %vm77_vm1, %v65_v57 }
  0x27   :  { %1693 = vmatpush3.bf16.msra.mxu1 %v2016_v13  ;;  %1546 = vmatprep.mubr.msk.f32.mxu0 %vm77_vm1, %v66_v58 }
  0x28   :  { %1700 = vmatprep.subr.bf16.mxu1 %v1891_v1 }
  0x2a   :  { %1547 = vmatmul.mubr.msk.f32.gmra.mrb[6].mxu0 %vm77_vm1, %v67_v59 }
  0x2b   :  { %1579 = vmatprep.mubr.msk.f32.mxu0 %vm1892_vm0, %v1893_v2 }
  0xf1   :  { %v1539_v15 = vpop.f32.mrb[0].mxu0 }
  0xf2   :  { %v168_v16 = vpop.f32.mrb[1].mxu0  ;;  %v174_v39 = vadd.f32 %v1539_v15, %v2037_v14 }
  0xf3   :  { %v169_v17 = vadd.f32 %v2037_v14, %v168_v16 }
  0xf5   :  { %v287_v18 = vpop.f32.mrb[0].mxu1  ;;  %v1542_v63 = vpop.f32.mrb[2].mxu0 }
  0xf6   :  { %v291_v19 = vadd.f32 %v287_v18, %v169_v17  ;;  %v1559_v20 = vpop.f32.mrb[1].mxu1  ;;  %v178_v0 = vpop.f32.mrb[3].mxu0 }
  0xf7   :  { %v179_v8 = vadd.f32 %v2037_v14, %v178_v0 }
  0xf8   :  { %v1441_v21 = vmul.f32 -1.442695, %v291_v19 }
  0xf9   :  { %v2096_v3 = vpop.f32.mrb[4].mxu0 }
  0xfa   :  { %1768 = vpow2.f32 %v1441_v21  ;;  %v2098_v4 = vpop.f32.mrb[5].mxu0 }
  0xfb   :  { %1770 = vtanh.f32 %v291_v19 }
  0xfd   :  { %v2100_v5 = vpop.f32.mrb[6].mxu0 }
  0xfe   :  { %v2102_v6 = vpop.f32.mrb[7].mxu0 }
 0x104   :  { %v1769_v22 = vpop.eup %1768 }
 0x105   :  { %v296_v24 = vadd.f32 1.0, %v1769_v22  ;;  %v1771_v27 = vpop.eup %1770 }
 0x107   :  { %1772 = vrcp.f32 %v296_v24 }
 0x111   :  { %v1773_v28 = vpop.eup %1772 }
 0x112   :  { %v299_v29 = vsel %vm2040_vm4, %v1771_v27, %v1773_v28 }
 0x113   :  { %302 = vrot.lane.b32.xlu0 %v299_v29, %s1894_s3  ;;  %v300_v32 = vmul.f32 0.0, %v299_v29 }
 0x185   :  { %v303_v30 = vpop.permute.xlu0 %302 }
 0x186   :  { %v305_v31 = vmul.f32 %v303_v30, %v299_v29 }
 0x188   :  { %307 = vrot.lane.b32.xlu0 %v305_v31, %s1895_s20  ;;  %v184_v31 = vadd.f32 %v1542_v63, %v2037_v14 }
 0x1fa   :  { %v308_v33 = vpop.permute.xlu0 %307 }
 0x1fb   :  { %v310_v34 = vadd.f32 %v308_v33, %v300_v32 }
 0x1fd   :  { %1774 = vtanh.f32 %v310_v34 }
 0x207   :  { %v1775_v35 = vpop.eup %1774 }
 0x208   :  { %313 = vrot.lane.b32.xlu1 %v1775_v35, %s1894_s3 }
 0x27a   :  { %v314_v36 = vpop.permute.xlu1 %313 }
 0x27b   :  { %v2049_v37 = vmul.f32 %v314_v36, %v299_v29 }
 0x27d   :  { %334 = vrot.lane.b32.xlu1 %v2049_v37, %s1895_s20 }
 0x2ef   :  { %v335_v38 = vpop.permute.xlu1 %334 }
 0x2f0   :  { %1569 = vmatmul.mubr.msk.f32.vlgmr.msra.gmra.mrb[2].mxu1 %vm217_vm5, %v335_v38 }
 0x2f1   :  { %1702 = vmatpush3.bf16.msra.mxu1 %v2003_v9  ;;  %1590 = vmatprep.mubr.msk.f32.mxu1 %vm1892_vm0, %v1893_v2 }
 0x2f2   :  { %1703 = vmatprep.subr.bf16.mxu1 %v1891_v1 }
 0x2f5   :  { %1705 = vmatpush3.bf16.msra.mxu1 %v2016_v13 }
 0x2f6   :  { %1712 = vmatprep.subr.bf16.mxu1 %v1891_v1 }
 0x3c3   :  { %v404_v40 = vpop.f32.mrb[2].mxu1 }
 0x3c4   :  { %v408_v41 = vadd.f32 %v404_v40, %v174_v39  ;;  %v1570_v42 = vpop.f32.mrb[3].mxu1 }
 0x3c6   :  { %v1444_v43 = vmul.f32 -1.442695, %v408_v41 }
 0x3c8   :  { %1776 = vpow2.f32 %v1444_v43 }
 0x3c9   :  { %1778 = vtanh.f32 %v408_v41 }
 0x3d2   :  { %v1777_v44 = vpop.eup %1776 }
 0x3d3   :  { %v413_v45 = vadd.f32 1.0, %v1777_v44  ;;  %v1779_v46 = vpop.eup %1778 }
 0x3d5   :  { %1780 = vrcp.f32 %v413_v45 }
 0x3df   :  { %v1781_v47 = vpop.eup %1780 }
 0x3e0   :  { %v416_v48 = vsel %vm2040_vm4, %v1779_v46, %v1781_v47 }
 0x3e1   :  { %419 = vrot.lane.b32.xlu0 %v416_v48, %s1894_s3  ;;  %v417_v51 = vmul.f32 %v416_v48, %v310_v34 }
 0x453   :  { %v420_v49 = vpop.permute.xlu0 %419 }
 0x454   :  { %v422_v50 = vmul.f32 %v420_v49, %v416_v48 }
 0x456   :  { %424 = vrot.lane.b32.xlu1 %v422_v50, %s1895_s20 }
 0x4c8   :  { %v425_v52 = vpop.permute.xlu1 %424 }
 0x4c9   :  { %v427_v53 = vadd.f32 %v425_v52, %v417_v51  ;;  %v189_v51 = vadd.f32 %v2037_v14, %v2098_v4 }
 0x4cb   :  { %1782 = vtanh.f32 %v427_v53 }
 0x4d5   :  { %v1783_v60 = vpop.eup %1782 }
 0x4d6   :  { %430 = vrot.lane.b32.xlu0 %v1783_v60, %s1894_s3 }
 0x548   :  { %v431_v61 = vpop.permute.xlu0 %430 }
 0x549   :  { %v2092_v62 = vmul.f32 %v431_v61, %v416_v48 }
 0x54b   :  { %443 = vrot.lane.b32.xlu1 %v2092_v62, %s1895_s20 }
 0x5bd   :  { %v444_v7 = vpop.permute.xlu1 %443 }
 0x5be   :  { %1580 = vmatmul.mubr.msk.f32.vlgmr.msra.gmra.mrb[8].mxu0 %vm217_vm5, %v444_v7 }
 0x5bf   :  { %1708 = vmatpush3.bf16.msra.mxu0 %v2003_v9  ;;  %1601 = vmatprep.mubr.msk.f32.mxu0 %vm1892_vm0, %v1893_v2 }
 0x5c0   :  { %1709 = vmatprep.subr.bf16.mxu0 %v1891_v1 }
 0x5c3   :  { %1711 = vmatpush3.bf16.msra.mxu0 %v2016_v13 }
 0x5c4   :  { %1718 = vmatprep.subr.bf16.mxu0 %v1891_v1 }
 0x691   :  { %v513_v10 = vpop.f32.mrb[8].mxu0 }
 0x692   :  { %v517_v11 = vadd.f32 %v513_v10, %v179_v8  ;;  %v1581_v12 = vpop.f32.mrb[9].mxu0 }
 0x694   :  { %v1446_v15 = vmul.f32 -1.442695, %v517_v11 }
 0x696   :  { %1784 = vpow2.f32 %v1446_v15  ;;  %v194_v15 = vadd.f32 %v2096_v3, %v2037_v14 }
 0x697   :  { %1786 = vtanh.f32 %v517_v11 }
 0x6a0   :  { %v1785_v16 = vpop.eup %1784 }
 0x6a1   :  { %v522_v17 = vadd.f32 1.0, %v1785_v16  ;;  %v1787_v18 = vpop.eup %1786 }
 0x6a3   :  { %1788 = vrcp.f32 %v522_v17 }
 0x6ad   :  { %v1789_v19 = vpop.eup %1788 }
 0x6ae   :  { %v525_v20 = vsel %vm2040_vm4, %v1787_v18, %v1789_v19 }
 0x6af   :  { %528 = vrot.lane.b32.xlu0 %v525_v20, %s1894_s3  ;;  %v526_v23 = vmul.f32 %v525_v20, %v427_v53 }
 0x721   :  { %v529_v21 = vpop.permute.xlu0 %528 }
 0x722   :  { %v531_v22 = vmul.f32 %v529_v21, %v525_v20 }
 0x724   :  { %533 = vrot.lane.b32.xlu1 %v531_v22, %s1895_s20 }
 0x796   :  { %v534_v24 = vpop.permute.xlu1 %533 }
 0x797   :  { %v536_v25 = vadd.f32 %v534_v24, %v526_v23 }
 0x799   :  { %1790 = vtanh.f32 %v536_v25 }
 0x7a3   :  { %v1791_v27 = vpop.eup %1790 }
 0x7a4   :  { %539 = vrot.lane.b32.xlu0 %v1791_v27, %s1894_s3 }
 0x816   :  { %v540_v28 = vpop.permute.xlu0 %539 }
 0x817   :  { %v2117_v29 = vmul.f32 %v540_v28, %v525_v20 }
 0x819   :  { %552 = vrot.lane.b32.xlu1 %v2117_v29, %s1895_s20 }
 0x88b   :  { %v553_v30 = vpop.permute.xlu1 %552 }
 0x88c   :  { %1591 = vmatmul.mubr.msk.f32.vlgmr.msra.gmra.mrb[4].mxu1 %vm217_vm5, %v553_v30 }
 0x88d   :  { %1714 = vmatpush3.bf16.msra.mxu1 %v2003_v9  ;;  %1612 = vmatprep.mubr.msk.f32.mxu1 %vm1892_vm0, %v1893_v2 }
 0x88e   :  { %1715 = vmatprep.subr.bf16.mxu1 %v1891_v1 }
 0x891   :  { %1717 = vmatpush3.bf16.msra.mxu1 %v2016_v13 }
 0x892   :  { %1724 = vmatprep.subr.bf16.mxu1 %v1891_v1 }
 0x95f   :  { %v622_v32 = vpop.f32.mrb[4].mxu1 }
 0x960   :  { %v626_v33 = vadd.f32 %v622_v32, %v184_v31  ;;  %v1592_v34 = vpop.f32.mrb[5].mxu1 }
 0x962   :  { %v1448_v35 = vmul.f32 -1.442695, %v626_v33 }
 0x964   :  { %1792 = vpow2.f32 %v1448_v35 }
 0x965   :  { %1794 = vtanh.f32 %v626_v33  ;;  %v199_v33 = vadd.f32 %v2037_v14, %v2102_v6 }
 0x96e   :  { %v1793_v36 = vpop.eup %1792 }
 0x96f   :  { %v631_v38 = vadd.f32 1.0, %v1793_v36  ;;  %v1795_v39 = vpop.eup %1794 }
 0x971   :  { %1796 = vrcp.f32 %v631_v38 }
 0x97b   :  { %v1797_v40 = vpop.eup %1796 }
 0x97c   :  { %v634_v41 = vsel %vm2040_vm4, %v1795_v39, %v1797_v40 }
 0x97d   :  { %637 = vrot.lane.b32.xlu0 %v634_v41, %s1894_s3  ;;  %v635_v44 = vmul.f32 %v634_v41, %v536_v25 }
 0x9ef   :  { %v638_v42 = vpop.permute.xlu0 %637 }
 0x9f0   :  { %v640_v43 = vmul.f32 %v638_v42, %v634_v41 }
 0x9f2   :  { %642 = vrot.lane.b32.xlu1 %v640_v43, %s1895_s20 }
 0xa64   :  { %v643_v45 = vpop.permute.xlu1 %642 }
 0xa65   :  { %v645_v46 = vadd.f32 %v643_v45, %v635_v44 }
 0xa67   :  { %1798 = vtanh.f32 %v645_v46 }
 0xa71   :  { %v1799_v47 = vpop.eup %1798 }
 0xa72   :  { %648 = vrot.lane.b32.xlu0 %v1799_v47, %s1894_s3 }
 0xae4   :  { %v649_v48 = vpop.permute.xlu0 %648 }
 0xae5   :  { %v2134_v49 = vmul.f32 %v649_v48, %v634_v41 }
 0xae7   :  { %661 = vrot.lane.b32.xlu1 %v2134_v49, %s1895_s20 }
 0xb59   :  { %v662_v50 = vpop.permute.xlu1 %661 }
 0xb5a   :  { %1602 = vmatmul.mubr.msk.f32.vlgmr.msra.gmra.mrb[10].mxu0 %vm217_vm5, %v662_v50 }
 0xb5b   :  { %1720 = vmatpush3.bf16.msra.mxu0 %v2003_v9  ;;  %1623 = vmatprep.mubr.msk.f32.mxu0 %vm1892_vm0, %v1893_v2 }
 0xb5c   :  { %1721 = vmatprep.subr.bf16.mxu0 %v1891_v1 }
 0xb5f   :  { %1723 = vmatpush3.bf16.msra.mxu0 %v2016_v13 }
 0xb60   :  { %1730 = vmatprep.subr.bf16.mxu0 %v1891_v1 }
 0xc2d   :  { %v731_v52 = vpop.f32.mrb[10].mxu0 }
 0xc2e   :  { %v735_v53 = vadd.f32 %v731_v52, %v189_v51  ;;  %v1603_v54 = vpop.f32.mrb[11].mxu0 }
 0xc30   :  { %v1450_v55 = vmul.f32 -1.442695, %v735_v53 }
 0xc32   :  { %1800 = vpow2.f32 %v1450_v55 }
 0xc33   :  { %1802 = vtanh.f32 %v735_v53  ;;  %v204_v53 = vadd.f32 %v2100_v5, %v2037_v14  ;;  %v1442_v14 = vld [vmem:[%s2306_s4] ss:$0 sm:$0xff] }
 0xc3c   :  { %v1801_v56 = vpop.eup %1800 }
 0xc3d   :  { %v740_v57 = vadd.f32 1.0, %v1801_v56  ;;  %v1803_v58 = vpop.eup %1802 }
 0xc3f   :  { %1804 = vrcp.f32 %v740_v57 }
 0xc49   :  { %v1805_v59 = vpop.eup %1804 }
 0xc4a   :  { %v743_v60 = vsel %vm2040_vm4, %v1803_v58, %v1805_v59 }
 0xc4b   :  { %746 = vrot.lane.b32.xlu0 %v743_v60, %s1894_s3  ;;  %v744_v0 = vmul.f32 %v743_v60, %v645_v46 }
 0xcbd   :  { %v747_v61 = vpop.permute.xlu0 %746 }
 0xcbe   :  { %v749_v63 = vmul.f32 %v747_v61, %v743_v60 }
 0xcc0   :  { %751 = vrot.lane.b32.xlu1 %v749_v63, %s1895_s20 }
 0xd32   :  { %v752_v4 = vpop.permute.xlu1 %751 }
 0xd33   :  { %v754_v7 = vadd.f32 %v752_v4, %v744_v0 }
 0xd35   :  { %1806 = vtanh.f32 %v754_v7 }
 0xd3f   :  { %v1807_v8 = vpop.eup %1806 }
 0xd40   :  { %757 = vrot.lane.b32.xlu0 %v1807_v8, %s1894_s3 }
 0xdb2   :  { %v758_v10 = vpop.permute.xlu0 %757 }
 0xdb3   :  { %v2152_v11 = vmul.f32 %v758_v10, %v743_v60 }
 0xdb5   :  { %770 = vrot.lane.b32.xlu1 %v2152_v11, %s1895_s20 }
 0xe27   :  { %v771_v12 = vpop.permute.xlu1 %770 }
 0xe28   :  { %1613 = vmatmul.mubr.msk.f32.vlgmr.msra.gmra.mrb[6].mxu1 %vm217_vm5, %v771_v12 }
 0xe29   :  { %1726 = vmatpush3.bf16.msra.mxu1 %v2003_v9  ;;  %1634 = vmatprep.mubr.msk.f32.mxu1 %vm1892_vm0, %v1893_v2 }
 0xe2a   :  { %1727 = vmatprep.subr.bf16.mxu1 %v1891_v1 }
 0xe2d   :  { %1729 = vmatpush3.bf16.msra.mxu1 %v2016_v13 }
 0xe2e   :  { %1736 = vmatprep.subr.bf16.mxu1 %v1891_v1 }
 0xefb   :  { %v840_v16 = vpop.f32.mrb[6].mxu1 }
 0xefc   :  { %v844_v17 = vadd.f32 %v840_v16, %v194_v15  ;;  %v1614_v18 = vpop.f32.mrb[7].mxu1 }
 0xefe   :  { %v1452_v19 = vmul.f32 -1.442695, %v844_v17 }
 0xf00   :  { %1808 = vpow2.f32 %v1452_v19 }
 0xf01   :  { %1810 = vtanh.f32 %v844_v17 }
 0xf0a   :  { %v1809_v20 = vpop.eup %1808 }
 0xf0b   :  { %v849_v21 = vadd.f32 1.0, %v1809_v20  ;;  %v1811_v9 = vpop.eup %1810 }
 0xf0d   :  { %1812 = vrcp.f32 %v849_v21 }
 0xf17   :  { %v1813_v22 = vpop.eup %1812 }
 0xf18   :  { %v852_v23 = vsel %vm2040_vm4, %v1811_v9, %v1813_v22  ;;  %v1897_v9 = vmov 0  }
 0xf19   :  { %855 = vrot.lane.b32.xlu0 %v852_v23, %s1894_s3  ;;  %v853_v3 = vmul.f32 %v852_v23, %v754_v7  ;;  %1766 = vset.pattern.permute.xlu1 %v1897_v9  ;;  %v1233_v9 = vld [vmem:[%s2310_s8 + $0x30] sm:$0xff] }
 0xf8b   :  { %v856_v13 = vpop.permute.xlu0 %855 }
 0xf8c   :  { %v858_v24 = vmul.f32 %v856_v13, %v852_v23 }
 0xf8e   :  { %860 = vrot.lane.b32.xlu1 %v858_v24, %s1895_s20 }
0x1000   :  { %v861_v25 = vpop.permute.xlu1 %860 }
0x1001   :  { %v863_v27 = vadd.f32 %v861_v25, %v853_v3 }
0x1003   :  { %1814 = vtanh.f32 %v863_v27 }
0x100d   :  { %v1815_v28 = vpop.eup %1814 }
0x100e   :  { %866 = vrot.lane.b32.xlu0 %v1815_v28, %s1894_s3 }
0x1080   :  { %v867_v30 = vpop.permute.xlu0 %866 }
0x1081   :  { %v2170_v31 = vmul.f32 %v867_v30, %v852_v23 }
0x1083   :  { %879 = vrot.lane.b32.xlu1 %v2170_v31, %s1895_s20 }
0x10f5   :  { %v880_v32 = vpop.permute.xlu1 %879 }
0x10f6   :  { %1624 = vmatmul.mubr.msk.f32.vlgmr.msra.gmra.mrb[12].mxu0 %vm217_vm5, %v880_v32 }
0x10f7   :  { %1645 = vmatprep.mubr.msk.f32.mxu0 %vm1892_vm0, %v1893_v2 }
0x11c9   :  { %v949_v34 = vpop.f32.mrb[12].mxu0 }
0x11ca   :  { %v953_v35 = vadd.f32 %v949_v34, %v199_v33  ;;  %v1625_v36 = vpop.f32.mrb[13].mxu0  ;;  %v1457_v33 = vld [vmem:[#allocation2] ss:$0 sm:$0xff] }
0x11cc   :  { %v1454_v38 = vmul.f32 -1.442695, %v953_v35 }
0x11ce   :  { %1816 = vpow2.f32 %v1454_v38 }
0x11cf   :  { %1818 = vtanh.f32 %v953_v35 }
0x11d8   :  { %v1817_v39 = vpop.eup %1816 }
0x11d9   :  { %v958_v40 = vadd.f32 1.0, %v1817_v39  ;;  %v1819_v41 = vpop.eup %1818 }
0x11db   :  { %1820 = vrcp.f32 %v958_v40 }
0x11e5   :  { %v1821_v42 = vpop.eup %1820 }
0x11e6   :  { %v961_v43 = vsel %vm2040_vm4, %v1819_v41, %v1821_v42 }
0x11e7   :  { %964 = vrot.lane.b32.xlu0 %v961_v43, %s1894_s3  ;;  %v962_v6 = vmul.f32 %v961_v43, %v863_v27 }
0x1259   :  { %v965_v44 = vpop.permute.xlu0 %964 }
0x125a   :  { %v967_v45 = vmul.f32 %v965_v44, %v961_v43 }
0x125c   :  { %969 = vrot.lane.b32.xlu1 %v967_v45, %s1895_s20 }
0x12ce   :  { %v970_v46 = vpop.permute.xlu1 %969 }
0x12cf   :  { %v972_v47 = vadd.f32 %v970_v46, %v962_v6 }
0x12d1   :  { %1822 = vtanh.f32 %v972_v47 }
0x12db   :  { %v1823_v48 = vpop.eup %1822 }
0x12dc   :  { %975 = vrot.lane.b32.xlu0 %v1823_v48, %s1894_s3 }
0x134e   :  { %v976_v50 = vpop.permute.xlu0 %975 }
0x134f   :  { %v978_v51 = vmul.f32 %v976_v50, %v961_v43 }
0x1351   :  { %988 = vrot.lane.b32.xlu1 %v978_v51, %s1895_s20 }
0x13c3   :  { %v989_v52 = vpop.permute.xlu1 %988 }
0x13c4   :  { %1635 = vmatmul.mubr.msk.f32.vlgmr.msra.gmra.mrb[8].mxu1 %vm217_vm5, %v989_v52 }
0x13c5   :  { %1664 = vmatprep.mubr.msk.f32.mxu1 %vm1892_vm0, %v1893_v2 }
0x1497   :  { %v1058_v54 = vpop.f32.mrb[8].mxu1 }
0x1498   :  { %v1062_v55 = vadd.f32 %v1058_v54, %v204_v53  ;;  %v1636_v56 = vpop.f32.mrb[9].mxu1 }
0x149a   :  { %v1456_v57 = vmul.f32 -1.442695, %v1062_v55 }
0x149c   :  { %1824 = vpow2.f32 %v1456_v57 }
0x149d   :  { %1826 = vtanh.f32 %v1062_v55 }
0x14a6   :  { %v1825_v58 = vpop.eup %1824 }
0x14a7   :  { %v1067_v59 = vadd.f32 1.0, %v1825_v58  ;;  %v1827_v60 = vpop.eup %1826 }
0x14a9   :  { %1828 = vrcp.f32 %v1067_v59 }
0x14b3   :  { %v1829_v61 = vpop.eup %1828 }
0x14b4   :  { %v1070_v63 = vsel %vm2040_vm4, %v1827_v60, %v1829_v61  ;;  %v1898_v60 = vmov 7  }
0x14b5   :  { %1073 = vrot.lane.b32.xlu0 %v1070_v63, %s1894_s3  ;;  %v1071_v12 = vmul.f32 %v1070_v63, %v972_v47 }
0x14b6   :  { %1767 = vset.pattern.permute.xlu0 %v1898_v60 }
0x14b9   :  { %322 = vrot.lane.b32.xlu0 %v1442_v14, %s1896_s16 }
0x1527   :  { %v1074_v5 = vpop.permute.xlu0 %1073 }
0x1528   :  { %v1076_v0 = vmul.f32 %v1074_v5, %v1070_v63  ;;  %v1140_v5 = vld [vmem:[#allocation3] sm:$0xff] }
0x152a   :  { %1078 = vrot.lane.b32.xlu1 %v1076_v0, %s1895_s20  ;;  %v1141_v0 = vld [vmem:[#allocation3 + $0x8] sm:$0xff] }
0x152b   :  { %v323_v4 = vpop.permute.xlu0 %322 }
0x152c   :  { %v325_v7 = vmul.f32 %v323_v4, %v2049_v37  ;;  %v543_v26 = vmul.f32 %v2117_v29, %v323_v4  ;;  %v761_v8 = vmul.f32 %v2152_v11, %v323_v4  ;;  %v979_v10 = vmul.f32 %v978_v51, %v323_v4 }
0x152d   :  { %v434_v11 = vmul.f32 %v2092_v62, %v323_v4  ;;  %v652_v20 = vmul.f32 %v2134_v49, %v323_v4  ;;  %v870_v21 = vmul.f32 %v2170_v31, %v323_v4 }
0x152e   :  { %327 = vrot.lane.b32.xlu0 %v325_v7, %s1895_s20  ;;  %v1731_v7 = vpack.c.bf16 %v1141_v0, %v1140_v5 }
0x1530   :  { %1732 = vmatpush3.bf16.msra.mxu0 %v1731_v7 }
0x1531   :  { %1733 = vmatprep.subr.bf16.mxu0 %v1891_v1 }
0x1532   :  { %545 = vrot.lane.b32.xlu0 %v543_v26, %s1895_s20  ;;  %v1143_v26 = vld [vmem:[#allocation3 + $0x18] sm:$0xff] }
0x1536   :  { %763 = vrot.lane.b32.xlu0 %v761_v8, %s1895_s20 }
0x153a   :  { %981 = vrot.lane.b32.xlu0 %v979_v10, %s1895_s20  ;;  %v1227_v10 = vld [vmem:[%s2310_s8] sm:$0xff] }
0x159c   :  { %v1079_v15 = vpop.permute.xlu1 %1078 }
0x159d   :  { %v1081_v16 = vadd.f32 %v1079_v15, %v1071_v12  ;;  %v1228_v12 = vld [vmem:[%s2310_s8 + $0x8] sm:$0xff]  ;;  %v1229_v15 = vld [vmem:[%s2310_s8 + $0x10] sm:$0xff] }
0x159f   :  { %1830 = vtanh.f32 %v1081_v16  ;;  %v1737_v16 = vpack.c.bf16 %v1228_v12, %v1227_v10 }
0x15a0   :  { %v328_v17 = vpop.permute.xlu0 %327 }
0x15a1   :  { %v330_v37 = vsel %vm217_vm5, %v328_v17, 0.0  ;;  %v1230_v17 = vld [vmem:[%s2310_s8 + $0x18] sm:$0xff]  ;;  %1738 = vmatpush3.bf16.msra.mxu1 %v1737_v16 }
0x15a2   :  { %331 = vadd.xlane.f32.xlu0 %v330_v37  ;;  %v1740_v37 = vpack.c.bf16 %v1230_v17, %v1229_v15  ;;  %1739 = vmatprep.subr.bf16.mxu1 %v1891_v1 }
0x15a4   :  { %v546_v18 = vpop.permute.xlu0 %545 }
0x15a5   :  { %v548_v29 = vsel %vm217_vm5, %v546_v18, 0.0  ;;  %v1231_v18 = vld [vmem:[%s2310_s8 + $0x20] sm:$0xff]  ;;  %1741 = vmatpush3.bf16.msra.mxu1 %v1740_v37 }
0x15a6   :  { %549 = vadd.xlane.f32.xlu0 %v548_v29  ;;  %v1232_v29 = vld [vmem:[%s2310_s8 + $0x28] sm:$0xff]  ;;  %1742 = vmatprep.subr.bf16.mxu1 %v1891_v1 }
0x15a8   :  { %v764_v27 = vpop.permute.xlu0 %763 }
0x15a9   :  { %v1831_v19 = vpop.eup %1830  ;;  %v766_v30 = vsel %vm217_vm5, %v764_v27, 0.0 }
0x15aa   :  { %1084 = vrot.lane.b32.xlu1 %v1831_v19, %s1894_s3  ;;  %v1743_v19 = vpack.c.bf16 %v1232_v29, %v1231_v18 }
0x15ac   :  { %v982_v31 = vpop.permute.xlu0 %981  ;;  %1744 = vmatpush3.bf16.msra.mxu1 %v1743_v19 }
0x15ad   :  { %v984_v32 = vsel %vm217_vm5, %v982_v31, 0.0  ;;  %1745 = vmatprep.subr.bf16.mxu1 %v1891_v1 }
0x15ae   :  { %436 = vrot.lane.b32.xlu1 %v434_v11, %s1895_s20 }
0x15b2   :  { %654 = vrot.lane.b32.xlu1 %v652_v20, %s1895_s20 }
0x15b6   :  { %872 = vrot.lane.b32.xlu1 %v870_v21, %s1895_s20 }
0x161c   :  { %v1085_v22 = vpop.permute.xlu1 %1084 }
0x161d   :  { %v2213_v23 = vmul.f32 %v1085_v22, %v1070_v63  ;;  %v1234_v22 = vld [vmem:[%s2310_s8 + $0x38] sm:$0xff] }
0x161f   :  { %v1088_v13 = vmul.f32 %v2213_v23, %v323_v4  ;;  %v1142_v4 = vld [vmem:[#allocation3 + $0x10] sm:$0xff] }
0x1620   :  { %v437_v24 = vpop.permute.xlu1 %436  ;;  %v1734_v8 = vpack.c.bf16 %v1143_v26, %v1142_v4 }
0x1621   :  { %1090 = vrot.lane.b32.xlu1 %v1088_v13, %s1895_s20  ;;  %v439_v28 = vsel %vm217_vm5, %v437_v24, 0.0  ;;  %v1317_v13 = vld [vmem:[%s2312_s10] sm:$0xff]  ;;  %v1318_v24 = vld [vmem:[%s2312_s10 + $0x8] sm:$0xff] }
0x1622   :  { %1735 = vmatpush3.bf16.msra.mxu0 %v1734_v8 }
0x1623   :  { %1748 = vmatprep.subr.bf16.mxu0 %v1891_v1 }
0x1624   :  { %v655_v62 = vpop.permute.xlu1 %654 }
0x1625   :  { %v657_v3 = vsel %vm217_vm5, %v655_v62, 0.0  ;;  %v1749_v62 = vpack.c.bf16 %v1318_v24, %v1317_v13 }
0x1626   :  { %658 = vadd.xlane.f32.xlu0 %v657_v3 }
0x1628   :  { %v873_v49 = vpop.permute.xlu1 %872 }
0x1629   :  { %v875_v25 = vsel %vm217_vm5, %v873_v49, 0.0 }
0x162a   :  { %876 = vadd.xlane.f32.xlu0 %v875_v25 }
0x162f   :  { %v332_v36 = vpop.xlane.xlu0 %331 }
0x1633   :  { %v550_v39 = vpop.xlane.xlu0 %549 }
0x1645   :  { %440 = vadd.xlane.f32.xlu1 %v439_v28  ;;  %v1319_v28 = vld [vmem:[%s2312_s10 + $0x10] sm:$0xff] }
0x1649   :  { %767 = vadd.xlane.f32.xlu1 %v766_v30  ;;  %v1320_v30 = vld [vmem:[%s2312_s10 + $0x18] sm:$0xff] }
0x164a   :  { %v1752_v31 = vpack.c.bf16 %v1320_v30, %v1319_v28 }
0x164d   :  { %985 = vadd.xlane.f32.xlu1 %v984_v32 }
0x165e   :  { %1117 = vperm.xlu1 %1766, %v1457_v33  }
0x1693   :  { %v1091_v34 = vpop.permute.xlu1 %1090 }
0x1694   :  { %v1093_v35 = vsel %vm217_vm5, %v1091_v34, 0.0 }
0x1695   :  { %1094 = vadd.xlane.f32.xlu0 %v1093_v35 }
0x16b3   :  { %v659_v42 = vpop.xlane.xlu0 %658 }
0x16b7   :  { %v877_v6 = vpop.xlane.xlu0 %876 }
0x16d2   :  { %v441_v38 = vpop.xlane.xlu1 %440 }
0x16d3   :  { %v1097_v40 = vsel %vm1096_vm6, %v332_v36, %v441_v38  ;;  %v1462_v36 = vld [vmem:[%s2313_s11] ss:$0 sm:$0xff] }
0x16d4   :  { %v1099_v43 = vsel %vm1098_vm7, %v1097_v40, %v550_v39 }
0x16d5   :  { %v1101_v44 = vsel %vm1100_vm8, %v1099_v43, %v659_v42 }
0x16d6   :  { %v768_v41 = vpop.xlane.xlu1 %767 }
0x16d7   :  { %v1103_v46 = vsel %vm1102_vm9, %v1101_v44, %v768_v41 }
0x16d8   :  { %v1105_v47 = vsel %vm1104_vm10, %v1103_v46, %v877_v6 }
0x16da   :  { %v986_v45 = vpop.xlane.xlu1 %985 }
0x16db   :  { %v1107_v50 = vsel %vm1106_vm11, %v1105_v47, %v986_v45 }
0x16de   :  { %v1118_v48 = vpop.permute.xlu1 %1117 }
0x1722   :  { %v1095_v51 = vpop.xlane.xlu0 %1094 }
0x1723   :  { %v1109_v52 = vsel %vm1108_vm12, %v1107_v50, %v1095_v51 }
0x1724   :  { %v1120_v53 = vadd.f32 %v1118_v48, %v1109_v52 }
0x1726   :  { %v1122_v54 = vsel %vm1121_vm13, %v1120_v53, -inf }
0x1727   :  { %1123 = vmax.xlane.f32.xlu0 %v1122_v54 }
0x17b4   :  { %v1124_v55 = vpop.xlane.xlu0 %1123 }
0x17b5   :  { %v1125_v56 = vsub.f32 %v1120_v53, %v1124_v55 }
0x17b7   :  { %v1126_v57 = vmul.f32 1.442695, %v1125_v56 }
0x17b9   :  { %1832 = vpow2.f32 %v1126_v57 }
0x17c3   :  { %v1833_v58 = vpop.eup %1832 }
0x17c4   :  { %v1128_v59 = vsel %vm1121_vm13, %v1833_v58, 0.0 }
0x17c5   :  { %1129 = vadd.xlane.f32.xlu0 %v1128_v59 }
0x1852   :  { %v1130_v61 = vpop.xlane.xlu0 %1129 }
0x1853   :  { %1834 = vrcp.f32 %v1130_v61 }
0x185d   :  { %v1835_v63 = vpop.eup %1834 }
0x185e   :  { %v1132_v14 = vmul.f32 %v1835_v63, %v1833_v58 }
0x1860   :  { %1136 = vperm.xlu0 %1767, %v1132_v14   ;;  %1133 = vst.msk [vmem:[#allocation6] sm:$0xff] %vm1121_vm13, %v1132_v14 }
0x18df   :  { %v1137_v11 = vpop.permute.xlu0 %1136 }
0x18e0   :  { %v1139_v20 = vmul.f32 %v1137_v11, %v2213_v23  ;;  %v1746_v23 = vpack.c.bf16 %v1234_v22, %v1233_v9 }
0x18e2   :  { %1152 = vrot.lane.b32.xlu1 %v1139_v20, %s1895_s20  ;;  %1747 = vmatpush3.bf16.msra.mxu1 %v1746_v23 }
0x1954   :  { %v1153_v21 = vpop.permute.xlu1 %1152 }
0x1955   :  { %1646 = vmatmul.mubr.msk.f32.vlgmr.msra.gmra.mrb[14].mxu0 %vm217_vm5, %v1153_v21 }
0x1956   :  { %1675 = vmatprep.mubr.msk.f32.mxu0 %vm1892_vm0, %v1893_v2  ;;  %1750 = vmatpush3.bf16.msra.mxu0 %v1749_v62  ;;  %v1458_v2 = vld [vmem:[%s2309_s7] ss:$0 sm:$0xff] }
0x1957   :  { %1751 = vmatprep.subr.bf16.mxu0 %v1891_v1  ;;  %v1460_v1 = vld [vmem:[%s2311_s9] ss:$0 sm:$0xff]  ;;  %s1899_s9 = smov [#allocation6]  }
0x1958   :  { %s1421_s10 = sshll.u32 %s1899_s9, 4  ;;  %s1422_s10 = int_to_ptr.vmem [resolvable:$true] %s1421_s10 }
0x1959   :  { %s1862_s5 = scalar_lea.vmem %s1422_s10, 128  ;;  %p1867_p9 = scmp.lt.s32.totalorder %s1422_s10, %s1422_s10 }
0x195a   :  { %1753 = vmatpush3.bf16.msra.mxu0 %v1752_v31  ;;  %p1863_p8 = scmp.ne.s32.totalorder %s1422_s10, %s1862_s5  ;;  %p1868_p10 = scmp.lt.s32.totalorder %s1862_s5, %s1862_s5 }
0x195c   :  { %p1869_p11 = por %p1868_p10, %p1867_p9 }
0x195e   :  { %p1870_p12 = pnand %p1869_p11, %p1863_p8 }
0x1a28   :  { %v1222_v3 = vpop.f32.mrb[14].mxu0 }
0x1a29   :  { %v1223_v49 = vadd.f32 %v1458_v2, %v1222_v3  ;;  %v1647_v25 = vpop.f32.mrb[15].mxu0 }
0x1a2b   :  { %v1226_v27 = vmax.f32 %v1223_v49, 0.0 }
0x1a2d   :  { %1665 = vmatmul.mubr.msk.f32.vlgmr.msra.gmra.mrb[10].mxu1 %vm1242_vm14, %v1226_v27 }
0x1b00   :  { %v1312_v32 = vpop.f32.mrb[10].mxu1 }
0x1b01   :  { %v1313_v33 = vadd.f32 %v1460_v1, %v1312_v32  ;;  %v1666_v34 = vpop.f32.mrb[11].mxu1 }
0x1b03   :  { %v1316_v35 = vmax.f32 %v1313_v33, 0.0 }
0x1b05   :  { %1676 = vmatmul.mubr.msk.f32.vlgmr.msra.gmra.mrb[16].mxu0 %vm217_vm5, %v1316_v35 }
0x1bd8   :  { %v1397_v38 = vpop.f32.mrb[16].mxu0 }
0x1bd9   :  { %v1398_v39 = vadd.f32 %v1462_v36, %v1397_v38  ;;  %v1677_v40 = vpop.f32.mrb[17].mxu0 }
0x1bdb   :  { %v1401_v41 = vsel %vm1102_vm9, %v1398_v39, -inf }
0x1bdc   :  { %1402 = vmax.xlane.f32.xlu1 %v1401_v41 }
0x1c69   :  { %v1403_v42 = vpop.xlane.xlu1 %1402 }
0x1c6a   :  { %v1404_v43 = vsub.f32 %v1398_v39, %v1403_v42 }
0x1c6c   :  { %v1405_v44 = vmul.f32 1.442695, %v1404_v43 }
0x1c6e   :  { %1836 = vpow2.f32 %v1405_v44 }
0x1c78   :  { %v1837_v45 = vpop.eup %1836 }
0x1c79   :  { %v1407_v6 = vsel %vm1102_vm9, %v1837_v45, 0.0 }
0x1c7a   :  { %1408 = vadd.xlane.f32.xlu0 %v1407_v6 }
0x1c7b   :  { %1873 = shalt.err (!%p1870_p12)
}
0x1c7c   :  { %s1874_s19 = scalar_lea.hbm %s2315_s13, 128 }
0x1c7d   :  { %p1875_p13 = scmp.ne.s32.totalorder %s2315_s13, %s1874_s19  ;;  %p1878_p0 = scmp.lt.u32.totalorder %s1874_s19, %s2315_s13 }
0x1c7f   :  { %p1880_p1 = pnand %p1878_p0, %p1875_p13 }
0x1c81   :  { %1883 = shalt.err (!%p1880_p1)
}
0x1c82   :  { %1424 = dma.vmem_to_hbm [thread:$0]  %s1422_s10, 128, %s2315_s13, [#allocation5]  }
0x1d07   :  { %v1409_v46 = vpop.xlane.xlu0 %1408 }
0x1d08   :  { %1838 = vrcp.f32 %v1409_v46 }
0x1d12   :  { %v1839_v47 = vpop.eup %1838 }
0x1d13   :  { %v1411_v48 = vmul.f32 %v1839_v47, %v1837_v45 }
0x1d15   :  { %1412 = vst.msk [vmem:[%s2314_s12] sm:$0xff] %vm1102_vm9, %v1411_v48 }
0x1d16   :  { %1886 = dma.done.wait [#allocation5], 128  }
0x1d17   :  { %1887 = vsyncadd [#allocation5], 4294967168 }
0x1d18   :  { %1430 = vsyncpa [#allocation4], 1 }
0x1d19   :  { %1431 = vsyncpa [#allocation5], 1 }

</bundles_post_ra>
